<compile_context>
chip_gen: v5e
topology: v5e:2x2
jax: 0.10.0
libtpu: 0.0.40
codegen_flags: <defaults>
</compile_context>

<pallas_src>
import functools

import jax
import jax.numpy as jnp
from jax.experimental import pallas as pl
from jax.experimental.pallas import tpu as pltpu

LANES = 128
SUBLANES = 8
MAX_TILE_ROWS = 2048        # 2048 * 128 * 4B = 1 MiB per input block (f32)
MIN_EXACT_TILE_ROWS = 512   # smallest "no-mask" tile we accept before falling back
MAX_ACC_ROWS = 64           # accumulator rows: 8 independent vreg chains


def _pick_tile_rows(n_rows):
    """Pick tile_rows (multiple of 8) and whether the last block needs masking."""
    if n_rows <= MAX_TILE_ROWS:
        return n_rows, False            # single full block (block == full array dims)
    # Prefer an exact divisor so every grid step is a full block (no masking at all).
    t = MAX_TILE_ROWS
    while t >= MIN_EXACT_TILE_ROWS:
        if n_rows % t == 0:
            return t, False
        t -= SUBLANES
    # No reasonable divisor: keep the big tile; only the last (ragged) block is masked.
    return MAX_TILE_ROWS, True


def _huber_kernel(yt_ref, yp_ref, out_ref, *, delta, tile_rows, acc_rows, n_rows,
                  mask_last):
    """Accumulate an (acc_rows, 128) partial sum of Huber losses across the grid."""
    i = pl.program_id(0)

    @pl.when(i == 0)
    def _():
        out_ref[...] = jnp.zeros_like(out_ref)

    yt = yt_ref[...].astype(jnp.float32)
    yp = yp_ref[...].astype(jnp.float32)
    residual = jnp.abs(yt - yp)
    # Algebraic form of the piecewise Huber loss (no compare+select):
    #   residual <  delta: clipped = residual -> 0.5 * residual^2
    #   residual >= delta: clipped = delta    -> delta * (residual - 0.5 * delta)
    clipped = jnp.minimum(residual, delta)
    loss = clipped * (residual - 0.5 * clipped)

    def accumulate(x):
        # (tile_rows, 128) -> (tile_rows // acc_rows, acc_rows, 128) splits along whole
        # (8, 128) tiles (acc_rows is a multiple of 8): pure VPU adds, 8 independent
        # vreg chains of depth tile_rows // acc_rows.
        out_ref[...] += x.reshape(tile_rows // acc_rows, acc_rows, LANES).sum(axis=0)

    if mask_last:
        last = pl.num_programs(0) - 1

        @pl.when(i != last)
        def _():
            accumulate(loss)            # hot path: full blocks, no masking cost

        @pl.when(i == last)
        def _():
            # Ragged last block: rows past n_rows are stale VMEM; zero them via a
            # select (so NaN/Inf garbage cannot propagate).
            row = i * tile_rows + jax.lax.broadcasted_iota(
                jnp.int32, (tile_rows, LANES), 0)
            accumulate(jnp.where(row < n_rows, loss, 0.0))
    else:
        accumulate(loss)


def huber_loss(y_true, y_pred, delta=1.0):
    assert y_true.shape == y_pred.shape
    n_elems = y_true.size
    delta = float(delta)

    yt = jnp.ravel(y_true)
    yp = jnp.ravel(y_pred)

    chunk = SUBLANES * LANES            # 1024: one (8, 128) vreg worth of elements
    n_main = (n_elems // chunk) * chunk
    rem = n_elems - n_main

    # Tail (< 1024 elements): tiny plain-jnp computation on a slice — no padded copy
    # of the full inputs.
    if rem:
        rt = jnp.abs(yt[n_main:].astype(jnp.float32) - yp[n_main:].astype(jnp.float32))
        ct = jnp.minimum(rt, delta)
        tail_sum = jnp.sum(ct * (rt - 0.5 * ct))
    else:
        tail_sum = jnp.zeros((), jnp.float32)

    if n_main == 0:
        # Input smaller than one vreg: nothing for the kernel to stream.
        return tail_sum / n_elems

    yt_main = (yt[:n_main] if rem else yt).reshape(n_main // LANES, LANES)
    yp_main = (yp[:n_main] if rem else yp).reshape(n_main // LANES, LANES)
    n_rows = n_main // LANES            # multiple of 8 by construction

    tile_rows, mask_last = _pick_tile_rows(n_rows)
    n_blocks = pl.cdiv(n_rows, tile_rows)

    # Accumulator height: largest power-of-two multiple of 8 (<= 64) dividing tile_rows.
    acc_rows = SUBLANES
    while acc_rows * 2 <= MAX_ACC_ROWS and tile_rows % (acc_rows * 2) == 0:
        acc_rows *= 2

    kernel = functools.partial(
        _huber_kernel,
        delta=delta,
        tile_rows=tile_rows,
        acc_rows=acc_rows,
        n_rows=n_rows,
        mask_last=mask_last,
    )

    partials = pl.pallas_call(
        kernel,
        out_shape=jax.ShapeDtypeStruct((acc_rows, LANES), jnp.float32),
        grid_spec=pltpu.PrefetchScalarGridSpec(
            num_scalar_prefetch=0,
            grid=(n_blocks,),
            in_specs=[
                pl.BlockSpec((tile_rows, LANES), lambda i: (i, 0)),
                pl.BlockSpec((tile_rows, LANES), lambda i: (i, 0)),
            ],
            out_specs=pl.BlockSpec((acc_rows, LANES), lambda i: (0, 0)),
        ),
        compiler_params=pltpu.CompilerParams(
            dimension_semantics=("arbitrary",),
            vmem_limit_bytes=32 * 1024 * 1024,
        ),
    )(yt_main, yp_main)

    # Tiny epilogue: one cross-lane reduce + mean over the true element count.
    return (jnp.sum(partials) + tail_sum) / n_elems


huber_loss_jit = jax.jit(huber_loss, static_argnames=("delta",))


def huber_loss_ref(y_true, y_pred, delta=1.0):
    residual = jnp.abs(y_true.astype(jnp.float32) - y_pred.astype(jnp.float32))
    squared = 0.5 * residual**2
    linear = delta * (residual - 0.5 * delta)
    return jnp.mean(jnp.where(residual < delta, squared, linear))


if __name__ == "__main__":
    key = jax.random.PRNGKey(0)
    keys = jax.random.split(key, 8)

    # Primary check: small NCHW-like input matching the module's typical usage.
    # 2048 elements -> 16 rows -> one full block, no masking, no tail.
    shape = (2, 4, 16, 16)
    y_true = jax.random.normal(keys[0], shape, dtype=jnp.float32)
    y_pred = jax.random.normal(keys[1], shape, dtype=jnp.float32) * 1.5
    out = jax.block_until_ready(huber_loss_jit(y_true, y_pred, delta=1.0))
    ref = huber_loss_ref(y_true, y_pred, delta=1.0)
    assert jnp.allclose(out, ref, rtol=1e-4, atol=1e-6), (out, ref)

    # Multi-block grid with an exact-divisor tile (2304 rows -> 2 x 1152-row blocks,
    # no masking anywhere).
    shape2 = (2, 9, 128, 128)
    y_true2 = jax.random.normal(keys[2], shape2, dtype=jnp.float32)
    y_pred2 = jax.random.normal(keys[3], shape2, dtype=jnp.float32) * 0.5
    out2 = jax.block_until_ready(huber_loss_jit(y_true2, y_pred2, delta=1.0))
    ref2 = huber_loss_ref(y_true2, y_pred2, delta=1.0)
    assert jnp.allclose(out2, ref2, rtol=1e-4, atol=1e-6), (out2, ref2)

    # Unaligned size (1155 elements): 1024-element kernel prefix + 131-element jnp tail.
    shape3 = (3, 5, 7, 11)
    y_true3 = jax.random.normal(keys[4], shape3, dtype=jnp.float32)
    y_pred3 = jax.random.normal(keys[5], shape3, dtype=jnp.float32) * 2.0
    out3 = jax.block_until_ready(huber_loss_jit(y_true3, y_pred3, delta=1.0))
    ref3 = huber_loss_ref(y_true3, y_pred3, delta=1.0)
    assert jnp.allclose(out3, ref3, rtol=1e-4, atol=1e-6), (out3, ref3)

    # Row count with no usable divisor (2056 = 8 * 257 rows): exercises the
    # pl.when-gated masked ragged last block.
    shape4 = (2056, 128)
    y_true4 = jax.random.normal(keys[6], shape4, dtype=jnp.float32)
    y_pred4 = jax.random.normal(keys[7], shape4, dtype=jnp.float32) * 0.8
    out4 = jax.block_until_ready(huber_loss_jit(y_true4, y_pred4, delta=1.0))
    ref4 = huber_loss_ref(y_true4, y_pred4, delta=1.0)
    assert jnp.allclose(out4, ref4, rtol=1e-4, atol=1e-6), (out4, ref4)

    print("KERNEL_OK")
</pallas_src>

<mosaic_0001>
module attributes {stable_mosaic.version = 11 : i64} {
  func.func @_huber_kernel(%arg0: i32, %arg1: memref<16x128xf32, #tpu.memory_space<vmem>>, %arg2: memref<16x128xf32, #tpu.memory_space<vmem>>, %arg3: memref<16x128xf32, #tpu.memory_space<vmem>>) attributes {dimension_semantics = [#tpu.dimension_semantics<arbitrary>], iteration_bounds = array<i64: 1>, scalar_prefetch = 0 : i64, scratch_operands = 0 : i64, tpu.core_type = #tpu.core_type<tc>, window_params = [{transform_indices = @transform_0, window_bounds = array<i64: 16, 128>}, {transform_indices = @transform_1, window_bounds = array<i64: 16, 128>}, {pipeline_mode = #tpu.pipeline_mode<synchronous>, transform_indices = @transform_2, window_bounds = array<i64: 16, 128>}]} {
    %c0_i32 = arith.constant 0 : i32
    %0 = arith.cmpi eq, %arg0, %c0_i32 : i32
    %1 = arith.extui %0 : i1 to i32
    %c0_i32_0 = arith.constant 0 : i32
    %2 = arith.cmpi ne, %1, %c0_i32_0 : i32
    scf.if %2 {
      %cst_10 = arith.constant 0.000000e+00 : f32
      %18 = vector.broadcast %cst_10 : f32 to vector<16x128xf32>
      %c0_11 = arith.constant 0 : index
      %c0_12 = arith.constant 0 : index
      %19 = vector.load %arg3[%c0_11, %c0_12] : memref<16x128xf32, #tpu.memory_space<vmem>>, vector<16x128xf32>
      tpu.vector_store %arg3[%c0_11, %c0_12], %18 {strides = array<i32>} : memref<16x128xf32, #tpu.memory_space<vmem>>, vector<16x128xf32>,
    } else {
    }
    %c0 = arith.constant 0 : index
    %c0_1 = arith.constant 0 : index
    %3 = vector.load %arg1[%c0, %c0_1] : memref<16x128xf32, #tpu.memory_space<vmem>>, vector<16x128xf32>
    %c0_2 = arith.constant 0 : index
    %c0_3 = arith.constant 0 : index
    %4 = vector.load %arg2[%c0_2, %c0_3] : memref<16x128xf32, #tpu.memory_space<vmem>>, vector<16x128xf32>
    %5 = arith.subf %3, %4 : vector<16x128xf32>
    %6 = math.absf %5 : vector<16x128xf32>
    %cst = arith.constant 1.000000e+00 : f32
    %7 = vector.broadcast %cst : f32 to vector<16x128xf32>
    %8 = arith.minimumf %6, %7 : vector<16x128xf32>
    %cst_4 = arith.constant 5.000000e-01 : f32
    %9 = vector.broadcast %cst_4 : f32 to vector<16x128xf32>
    %10 = arith.mulf %9, %8 : vector<16x128xf32>
    %11 = arith.subf %6, %10 : vector<16x128xf32>
    %12 = arith.mulf %8, %11 : vector<16x128xf32>
    %c0_5 = arith.constant 0 : index
    %c0_6 = arith.constant 0 : index
    %13 = vector.load %arg3[%c0_5, %c0_6] : memref<16x128xf32, #tpu.memory_space<vmem>>, vector<16x128xf32>
    %14 = vector.shape_cast %12 : vector<16x128xf32> to vector<1x16x128xf32>
    %cst_7 = arith.constant dense<0.000000e+00> : vector<16x128xf32>
    %15 = vector.multi_reduction <add>, %14, %cst_7 [0] : vector<1x16x128xf32> to vector<16x128xf32>
    %16 = arith.addf %13, %15 : vector<16x128xf32>
    %c0_8 = arith.constant 0 : index
    %c0_9 = arith.constant 0 : index
    %17 = vector.load %arg3[%c0_8, %c0_9] : memref<16x128xf32, #tpu.memory_space<vmem>>, vector<16x128xf32>
    tpu.vector_store %arg3[%c0_8, %c0_9], %16 {strides = array<i32>} : memref<16x128xf32, #tpu.memory_space<vmem>>, vector<16x128xf32>,
    return
  }
  func.func @transform_0(%arg0: i32) -> (i32, i32) {
    %c0_i32 = arith.constant 0 : i32
    %c0_i32_0 = arith.constant 0 : i32
    return %arg0, %c0_i32 : i32, i32
  }
  func.func @transform_1(%arg0: i32) -> (i32, i32) {
    %c0_i32 = arith.constant 0 : i32
    %c0_i32_0 = arith.constant 0 : i32
    return %arg0, %c0_i32 : i32, i32
  }
  func.func @transform_2(%arg0: i32) -> (i32, i32) {
    %c0_i32 = arith.constant 0 : i32
    %c0_i32_0 = arith.constant 0 : i32
    %c0_i32_1 = arith.constant 0 : i32
    return %c0_i32, %c0_i32_0 : i32, i32
  }
}

</mosaic_0001>

<bundles_post_ra>
// kernel: huber_loss.1
= control target key start
LH: loop header
LB: loop body
LE: loop exit
PB: predicated region body
PF: predicated region fallthrough
CT: control target
= control target key end

     0   :  { %s79_s0 = inlined_call_operand.vmem [shape: f32[16,128], index: 0, kind: input, shape index: {}]   ;;  %s80_s1 = inlined_call_operand.vmem [shape: f32[16,128], index: 1, kind: input, shape index: {}]   ;;  %s81_s2 = inlined_call_operand.vmem [shape: f32[16,128], index: 2, kind: output, shape index: {}]  }
   0x1   :  { %v17_v0 = vld [vmem:[%s79_s0] sm:$0xff]  ;;  %v18_v2 = vld [vmem:[%s79_s0 + $0x8] sm:$0xff] }
   0x2   :  { %v19_v1 = vld [vmem:[%s80_s1] sm:$0xff]  ;;  %v20_v4 = vld [vmem:[%s80_s1 + $0x8] sm:$0xff] }
   0x3   :  { %v21_v3 = vsub.f32 %v17_v0, %v19_v1  ;;  %v22_v5 = vsub.f32 %v18_v2, %v20_v4 }
   0x5   :  { %v23_v6 = vand.u32 2147483647, %v21_v3  ;;  %v24_v7 = vand.u32 2147483647, %v22_v5 }
   0x7   :  { %v25_v8 = vmin.f32 %v23_v6, 1.0  ;;  %v26_v9 = vmin.f32 %v24_v7, 1.0 }
   0x9   :  { %v27_v10 = vmul.f32 0.5, %v25_v8  ;;  %v28_v11 = vmul.f32 0.5, %v26_v9 }
   0xb   :  { %v29_v12 = vsub.f32 %v23_v6, %v27_v10  ;;  %v30_v13 = vsub.f32 %v24_v7, %v28_v11 }
   0xd   :  { %v31_v14 = vmul.f32 %v29_v12, %v25_v8  ;;  %v32_v15 = vmul.f32 %v30_v13, %v26_v9 }
   0xf   :  { %39 = vst [vmem:[%s81_s2] sm:$0xff] %v31_v14 }
  0x10   :  { %40 = vst [vmem:[%s81_s2 + $0x8] sm:$0xff] %v32_v15 }

</bundles_post_ra>
